<compile_context>
chip_gen: v6e
topology: v6e:2x2x1
jax: 0.10.0
libtpu: 0.0.40
codegen_flags: <defaults>
</compile_context>

<pallas_src>
import functools

import jax
import jax.numpy as jnp
from jax import lax
from jax.experimental import pallas as pl
from jax.experimental.pallas import tpu as pltpu


def _round_up(x, m):
    return (x + m - 1) // m * m


def _clip_loss_kernel(img_ref, txt_ref, loss_ref,
                      img_nb_ref, row_s_ref, col_s_ref, acc_ref,
                      *, inv_t, batch, tile, need_mask):
    i = pl.program_id(0)          # image row tile (outer axis)
    j = pl.program_id(1)          # text column tile (inner axis)
    ni = pl.num_programs(0)
    nj = pl.num_programs(1)

    # Unit-norm features => |logits| <= 1/T, so a constant shift of 1/T is an
    # overflow-safe LSE shift shared by the row and column accumulators.
    # TODO(synk): if temperature can drop below ~0.05 (learnable logit_scale),
    # switch to a running-max (flash-style) shift for the column sums.
    shift = jnp.float32(inv_t)
    eps2 = jnp.float32(1e-24)     # F.normalize eps=1e-12, squared

    @pl.when(jnp.logical_and(i == 0, j == 0))
    def _init():
        col_s_ref[...] = jnp.zeros_like(col_s_ref)
        acc_ref[...] = jnp.zeros_like(acc_ref)

    # Once per row tile (hoisted over the column axis): normalize the image
    # rows in f32, fold 1/temperature into the per-row scale, store bf16 for
    # the MXU, and reset the per-row exp-sum accumulator.
    @pl.when(j == 0)
    def _row_tile_init():
        img = img_ref[...].astype(jnp.float32)
        scale = lax.rsqrt(
            jnp.maximum(jnp.sum(img * img, axis=-1, keepdims=True), eps2))
        img_nb_ref[...] = (img * (scale * inv_t)).astype(img_nb_ref.dtype)
        row_s_ref[...] = jnp.zeros_like(row_s_ref)

    img_nb = img_nb_ref[...]                    # (tile, D) bf16, scaled by 1/T
    txt_nb = txt_ref[...]                       # (tile, D) bf16, unit-norm

    # (tile, tile) logits block on the MXU: bf16 x bf16 -> f32 accumulate,
    # contracting the lane axis of both operands (no transpose).
    logits = lax.dot_general(
        img_nb, txt_nb,
        dimension_numbers=(((1,), (1,)), ((), ())),
        preferred_element_type=jnp.float32)

    # Single exp pass shared by the row LSE and the online column sums.
    e = jnp.exp(logits - shift)                 # (tile, tile)

    if need_mask:
        row_ids = i * tile + lax.broadcasted_iota(jnp.int32, (tile, 1), 0)
        col_ids = j * tile + lax.broadcasted_iota(jnp.int32, (1, tile), 1)
        row_m = (row_ids < batch).astype(jnp.float32)       # (tile, 1)
        col_m = (col_ids < batch).astype(jnp.float32)       # (1, tile)
        e = e * col_m                     # drop pad columns from row sums
        e_cols = e * row_m                # and pad rows from column sums
    else:
        row_m = None
        e_cols = e

    row_s_ref[...] += jnp.sum(e, axis=-1, keepdims=True)            # (tile, 1)
    col_s_ref[j] = col_s_ref[j] + jnp.sum(e_cols, axis=0, keepdims=True)

    # Diagonal ("correct pair") logits live in the j == i block; use a
    # row-wise dot instead of an iota/mask over the logits tile.
    @pl.when(j == i)
    def _diag():
        d = jnp.sum(img_nb.astype(jnp.float32) * txt_nb.astype(jnp.float32),
                    axis=-1, keepdims=True)                          # (tile, 1)
        if need_mask:
            d = d * row_m
        acc_ref[...] += -2.0 * jnp.sum(d, keepdims=True)

    # Row tile finished: fold its row log-sum-exp into the running scalar.
    @pl.when(j == nj - 1)
    def _row_tile_done():
        lse_r = shift + jnp.log(row_s_ref[...])                      # (tile, 1)
        if need_mask:
            lse_r = lse_r * row_m
        acc_ref[...] += jnp.sum(lse_r, keepdims=True)

    @pl.when(jnp.logical_and(i == ni - 1, j == nj - 1))
    def _finalize():
        cs = col_s_ref[...]                                   # (nj, 1, tile)
        lse_c = shift + jnp.log(jnp.maximum(cs, jnp.float32(1e-30)))
        if need_mask:
            cids = (lax.broadcasted_iota(jnp.int32, cs.shape, 0) * tile
                    + lax.broadcasted_iota(jnp.int32, cs.shape, 2))
            lse_c = jnp.where(cids < batch, lse_c, 0.0)
        total = jnp.sum(acc_ref[...]) + jnp.sum(lse_c)
        # loss = (loss_img + loss_txt)/2
        #      = (sum lse_row + sum lse_col - 2 * sum diag) / (2B)
        loss_ref[0, 0] = total * jnp.float32(0.5 / batch)


def clip_loss(image_features, text_features, temperature=0.1, tile_b=256,
              mxu_dtype=jnp.bfloat16):
    B, D = image_features.shape
    assert text_features.shape == (B, D)

    # One tile size for both row and column axes (so the diagonal block is the
    # j == i tile).  >=256 keeps the MXU M/N full on v6e/v7x; pad B up to a
    # tile multiple and mask instead of a single (B, B) fallback tile.
    if B <= tile_b:
        tile = _round_up(B, 8)
    else:
        assert tile_b % 128 == 0, "tile_b should be a multiple of 128"
        tile = tile_b
    b_pad = _round_up(B, tile)
    need_mask = b_pad != B
    ni = nj = b_pad // tile

    # Hoist text normalization out of the grid loop entirely (tiny O(B*D) XLA
    # op) and hand the kernel MXU-ready bf16 operands.
    txt = text_features.astype(jnp.float32)
    txt_n = txt * lax.rsqrt(
        jnp.maximum(jnp.sum(txt * txt, axis=-1, keepdims=True),
                    jnp.float32(1e-24)))
    txt_nb = txt_n.astype(mxu_dtype)

    img = image_features
    if need_mask:
        img = jnp.pad(img, ((0, b_pad - B), (0, 0)))
        txt_nb = jnp.pad(txt_nb, ((0, b_pad - B), (0, 0)))

    kernel = functools.partial(
        _clip_loss_kernel,
        inv_t=float(1.0 / temperature), batch=B, tile=tile,
        need_mask=need_mask)

    # Explicit VMEM budget: double-buffered image + text tiles, the bf16 image
    # scratch, the column-sum scratch, and ~4 (tile, tile) f32 temporaries.
    itemsize_img = jnp.dtype(img.dtype).itemsize
    itemsize_mxu = jnp.dtype(mxu_dtype).itemsize
    est = (2 * tile * D * itemsize_img
           + 2 * tile * D * itemsize_mxu
           + tile * D * itemsize_mxu
           + nj * 8 * tile * 4 + 8 * tile * 4
           + 4 * tile * tile * 4)
    vmem_limit = int(min(64 << 20, max(2 * est, 16 << 20)))

    out = pl.pallas_call(
        kernel,
        out_shape=jax.ShapeDtypeStruct((1, 1), jnp.float32),
        grid=(ni, nj),
        in_specs=[
            pl.BlockSpec((tile, D), lambda i, j: (i, 0)),   # image row tile
            pl.BlockSpec((tile, D), lambda i, j: (j, 0)),   # normalized text tile
        ],
        out_specs=pl.BlockSpec(memory_space=pltpu.MemorySpace.SMEM),
        scratch_shapes=[
            pltpu.VMEM((tile, D), mxu_dtype),        # normalized, 1/T-scaled image tile
            pltpu.VMEM((tile, 1), jnp.float32),      # per-row running exp sums
            pltpu.VMEM((nj, 1, tile), jnp.float32),  # per-column running exp sums
            pltpu.VMEM((1, 1), jnp.float32),         # running scalar accumulator
        ],
        compiler_params=pltpu.CompilerParams(
            # Both axes carry accumulator state across steps.
            # TODO(synk): on v7x, split the row axis across the two TensorCores
            # (per-core col_s/acc partials + a tiny combine epilogue).
            dimension_semantics=("arbitrary", "arbitrary"),
            vmem_limit_bytes=vmem_limit,
        ),
    )(img, txt_nb)
    return out[0, 0]


def _clip_loss_ref(image_features, text_features, temperature=0.1):
    # Plain-JAX reference matching the PyTorch module.
    def norm(x):
        return x / jnp.maximum(
            jnp.linalg.norm(x, axis=-1, keepdims=True), 1e-12)
    img = norm(image_features.astype(jnp.float32))
    txt = norm(text_features.astype(jnp.float32))
    logits = img @ txt.T / temperature
    B = logits.shape[0]
    idx = jnp.arange(B)

    def ce(lg):
        lse = jax.scipy.special.logsumexp(lg, axis=-1)
        return jnp.mean(lse - lg[idx, idx])

    return (ce(logits) + ce(logits.T)) / 2.0


if __name__ == "__main__":
    key = jax.random.PRNGKey(0)
    k1, k2 = jax.random.split(key)
    B, D = 8, 32
    image_features = jax.random.normal(k1, (B, D), dtype=jnp.float32)
    text_features = jax.random.normal(k2, (B, D), dtype=jnp.float32)

    loss = clip_loss(image_features, text_features, temperature=0.1)
    loss = jax.block_until_ready(loss)
    ref = _clip_loss_ref(image_features, text_features, temperature=0.1)
    # bf16 MXU operands carry ~2^-8 relative error on the logits (scaled by
    # 1/T), so the tolerance is loosened vs strict f32 parity.
    assert jnp.allclose(loss, ref, rtol=5e-2, atol=5e-2), (loss, ref)

    # Non-divisible batch exercises the pad + mask path.
    k3, k4 = jax.random.split(k2)
    img2 = jax.random.normal(k3, (12, D), dtype=jnp.float32)
    txt2 = jax.random.normal(k4, (12, D), dtype=jnp.float32)
    loss2 = jax.block_until_ready(clip_loss(img2, txt2, temperature=0.1))
    ref2 = _clip_loss_ref(img2, txt2, temperature=0.1)
    assert jnp.allclose(loss2, ref2, rtol=5e-2, atol=5e-2), (loss2, ref2)

    print("KERNEL_OK")
</pallas_src>

<mosaic_0001>
module attributes {stable_mosaic.version = 11 : i64} {
  func.func @_clip_loss_kernel(%arg0: i32, %arg1: i32, %arg2: memref<8x32xf32, #tpu.memory_space<vmem>>, %arg3: memref<8x32xbf16, #tpu.memory_space<vmem>>, %arg4: memref<1x1xf32, #tpu.memory_space<smem>>, %arg5: memref<8x32xbf16, #tpu.memory_space<vmem>>, %arg6: memref<8x1xf32, #tpu.memory_space<vmem>>, %arg7: memref<1x1x8xf32, #tpu.memory_space<vmem>>, %arg8: memref<1x1xf32, #tpu.memory_space<vmem>>) attributes {dimension_semantics = [#tpu.dimension_semantics<arbitrary>, #tpu.dimension_semantics<arbitrary>], iteration_bounds = array<i64: 1, 1>, scalar_prefetch = 0 : i64, scratch_operands = 4 : i64, tpu.core_type = #tpu.core_type<tc>, window_params = [{transform_indices = @transform_0, window_bounds = array<i64: 8, 32>}, {transform_indices = @transform_1, window_bounds = array<i64: 8, 32>}, {transform_indices = @transform_2, window_bounds = array<i64: 1, 1>}]} {
    %c0_i32 = arith.constant 0 : i32
    %0 = arith.cmpi eq, %arg0, %c0_i32 : i32
    %c0_i32_0 = arith.constant 0 : i32
    %1 = arith.cmpi eq, %arg1, %c0_i32_0 : i32
    %2 = arith.andi %0, %1 : i1
    %3 = arith.extui %2 : i1 to i32
    %c0_i32_1 = arith.constant 0 : i32
    %4 = arith.cmpi ne, %3, %c0_i32_1 : i32
    scf.if %4 {
      %cst_27 = arith.constant 0.000000e+00 : f32
      %40 = vector.broadcast %cst_27 : f32 to vector<1x1x8xf32>
      %c0_28 = arith.constant 0 : index
      %c0_29 = arith.constant 0 : index
      %c0_30 = arith.constant 0 : index
      %41 = vector.load %arg7[%c0_28, %c0_29, %c0_30] : memref<1x1x8xf32, #tpu.memory_space<vmem>>, vector<1x1x8xf32>
      tpu.vector_store %arg7[%c0_28, %c0_29, %c0_30], %40 {strides = array<i32>} : memref<1x1x8xf32, #tpu.memory_space<vmem>>, vector<1x1x8xf32>,
      %cst_31 = arith.constant 0.000000e+00 : f32
      %42 = vector.broadcast %cst_31 : f32 to vector<1x1xf32>
      %c0_32 = arith.constant 0 : index
      %c0_33 = arith.constant 0 : index
      %43 = vector.load %arg8[%c0_32, %c0_33] : memref<1x1xf32, #tpu.memory_space<vmem>>, vector<1x1xf32>
      tpu.vector_store %arg8[%c0_32, %c0_33], %42 {strides = array<i32>} : memref<1x1xf32, #tpu.memory_space<vmem>>, vector<1x1xf32>,
    } else {
    }
    %c0_i32_2 = arith.constant 0 : i32
    %5 = arith.cmpi eq, %arg1, %c0_i32_2 : i32
    %6 = arith.extui %5 : i1 to i32
    %cst = arith.constant 1.000000e-24 : f32
    %c0_i32_3 = arith.constant 0 : i32
    %7 = arith.cmpi ne, %6, %c0_i32_3 : i32
    scf.if %7 {
      %c0_27 = arith.constant 0 : index
      %c0_28 = arith.constant 0 : index
      %40 = vector.load %arg2[%c0_27, %c0_28] : memref<8x32xf32, #tpu.memory_space<vmem>>, vector<8x32xf32>
      %41 = arith.mulf %40, %40 : vector<8x32xf32>
      %cst_29 = arith.constant dense<0.000000e+00> : vector<8xf32>
      %42 = vector.multi_reduction <add>, %41, %cst_29 [1] : vector<8x32xf32> to vector<8xf32>
      %43 = vector.shape_cast %42 : vector<8xf32> to vector<8x1xf32>
      %44 = vector.broadcast %cst : f32 to vector<8x1xf32>
      %45 = arith.maximumf %43, %44 : vector<8x1xf32>
      %46 = math.rsqrt %45 : vector<8x1xf32>
      %cst_30 = arith.constant 1.000000e+01 : f32
      %47 = vector.broadcast %cst_30 : f32 to vector<8x1xf32>
      %48 = arith.mulf %46, %47 : vector<8x1xf32>
      %49 = vector.broadcast %48 : vector<8x1xf32> to vector<8x32xf32>
      %50 = arith.mulf %40, %49 : vector<8x32xf32>
      %51 = arith.truncf %50 : vector<8x32xf32> to vector<8x32xbf16>
      %c0_31 = arith.constant 0 : index
      %c0_32 = arith.constant 0 : index
      %52 = vector.load %arg5[%c0_31, %c0_32] : memref<8x32xbf16, #tpu.memory_space<vmem>>, vector<8x32xbf16>
      tpu.vector_store %arg5[%c0_31, %c0_32], %51 {strides = array<i32>} : memref<8x32xbf16, #tpu.memory_space<vmem>>, vector<8x32xbf16>,
      %cst_33 = arith.constant 0.000000e+00 : f32
      %53 = vector.broadcast %cst_33 : f32 to vector<8x1xf32>
      %c0_34 = arith.constant 0 : index
      %c0_35 = arith.constant 0 : index
      %54 = vector.load %arg6[%c0_34, %c0_35] : memref<8x1xf32, #tpu.memory_space<vmem>>, vector<8x1xf32>
      tpu.vector_store %arg6[%c0_34, %c0_35], %53 {strides = array<i32>} : memref<8x1xf32, #tpu.memory_space<vmem>>, vector<8x1xf32>,
    } else {
    }
    %c0 = arith.constant 0 : index
    %c0_4 = arith.constant 0 : index
    %8 = vector.load %arg5[%c0, %c0_4] : memref<8x32xbf16, #tpu.memory_space<vmem>>, vector<8x32xbf16>
    %c0_5 = arith.constant 0 : index
    %c0_6 = arith.constant 0 : index
    %9 = vector.load %arg3[%c0_5, %c0_6] : memref<8x32xbf16, #tpu.memory_space<vmem>>, vector<8x32xbf16>
    %cst_7 = arith.constant dense<0.000000e+00> : vector<8x8xf32>
    %10 = tpu.matmul %8, %9, %cst_7 {dimension_numbers = #tpu.dot_dimension_numbers<[1], [1], [0], [0], [0, 0, 1, 0], [], []>} : vector<8x32xbf16>, vector<8x32xbf16>, vector<8x8xf32> -> vector<8x8xf32>
    %cst_8 = arith.constant 1.000000e+01 : f32
    %11 = vector.broadcast %cst_8 : f32 to vector<8x8xf32>
    %12 = arith.subf %10, %11 : vector<8x8xf32>
    %13 = math.exp %12 : vector<8x8xf32>
    %c0_9 = arith.constant 0 : index
    %c0_10 = arith.constant 0 : index
    %14 = vector.load %arg6[%c0_9, %c0_10] : memref<8x1xf32, #tpu.memory_space<vmem>>, vector<8x1xf32>
    %cst_11 = arith.constant dense<0.000000e+00> : vector<8xf32>
    %15 = vector.multi_reduction <add>, %13, %cst_11 [1] : vector<8x8xf32> to vector<8xf32>
    %16 = vector.shape_cast %15 : vector<8xf32> to vector<8x1xf32>
    %17 = arith.addf %14, %16 : vector<8x1xf32>
    %c0_12 = arith.constant 0 : index
    %c0_13 = arith.constant 0 : index
    %18 = vector.load %arg6[%c0_12, %c0_13] : memref<8x1xf32, #tpu.memory_space<vmem>>, vector<8x1xf32>
    tpu.vector_store %arg6[%c0_12, %c0_13], %17 {strides = array<i32>} : memref<8x1xf32, #tpu.memory_space<vmem>>, vector<8x1xf32>,
    %19 = arith.index_cast %arg1 : i32 to index
    %c0_14 = arith.constant 0 : index
    %c0_15 = arith.constant 0 : index
    %20 = vector.load %arg7[%19, %c0_14, %c0_15] : memref<1x1x8xf32, #tpu.memory_space<vmem>>, vector<1x1x8xf32>
    %21 = vector.shape_cast %20 : vector<1x1x8xf32> to vector<1x8xf32>
    %cst_16 = arith.constant dense<0.000000e+00> : vector<8xf32>
    %22 = vector.multi_reduction <add>, %13, %cst_16 [0] : vector<8x8xf32> to vector<8xf32>
    %23 = vector.shape_cast %22 : vector<8xf32> to vector<1x8xf32>
    %24 = arith.addf %21, %23 : vector<1x8xf32>
    %25 = arith.index_cast %arg1 : i32 to index
    %c0_17 = arith.constant 0 : index
    %c0_18 = arith.constant 0 : index
    %26 = vector.load %arg7[%25, %c0_17, %c0_18] : memref<1x1x8xf32, #tpu.memory_space<vmem>>, vector<1x1x8xf32>
    %27 = vector.shape_cast %26 : vector<1x1x8xf32> to vector<1x8xf32>
    %28 = vector.shape_cast %24 : vector<1x8xf32> to vector<1x1x8xf32>
    tpu.vector_store %arg7[%25, %c0_17, %c0_18], %28 {strides = array<i32>} : memref<1x1x8xf32, #tpu.memory_space<vmem>>, vector<1x1x8xf32>,
    %29 = arith.cmpi eq, %arg1, %arg0 : i32
    %30 = arith.extui %29 : i1 to i32
    %c0_i32_19 = arith.constant 0 : i32
    %31 = arith.cmpi ne, %30, %c0_i32_19 : i32
    scf.if %31 {
      %40 = arith.extf %8 : vector<8x32xbf16> to vector<8x32xf32>
      %41 = arith.extf %9 : vector<8x32xbf16> to vector<8x32xf32>
      %42 = arith.mulf %40, %41 : vector<8x32xf32>
      %cst_27 = arith.constant dense<0.000000e+00> : vector<8xf32>
      %43 = vector.multi_reduction <add>, %42, %cst_27 [1] : vector<8x32xf32> to vector<8xf32>
      %44 = vector.shape_cast %43 : vector<8xf32> to vector<8x1xf32>
      %c0_28 = arith.constant 0 : index
      %c0_29 = arith.constant 0 : index
      %45 = vector.load %arg8[%c0_28, %c0_29] : memref<1x1xf32, #tpu.memory_space<vmem>>, vector<1x1xf32>
      %46 = vector.shape_cast %44 : vector<8x1xf32> to vector<1x8x1xf32>
      %cst_30 = arith.constant dense<0.000000e+00> : vector<1xf32>
      %47 = vector.multi_reduction <add>, %46, %cst_30 [1, 2] : vector<1x8x1xf32> to vector<1xf32>
      %48 = vector.shape_cast %47 : vector<1xf32> to vector<1x1x1xf32>
      %49 = vector.extract %48[0, 0, 0] : f32 from vector<1x1x1xf32>
      %50 = vector.broadcast %49 : f32 to vector<1x1xf32>
      %cst_31 = arith.constant -2.000000e+00 : f32
      %51 = vector.broadcast %cst_31 : f32 to vector<1x1xf32>
      %52 = arith.mulf %51, %50 : vector<1x1xf32>
      %53 = arith.addf %45, %52 : vector<1x1xf32>
      %c0_32 = arith.constant 0 : index
      %c0_33 = arith.constant 0 : index
      %54 = vector.load %arg8[%c0_32, %c0_33] : memref<1x1xf32, #tpu.memory_space<vmem>>, vector<1x1xf32>
      tpu.vector_store %arg8[%c0_32, %c0_33], %53 {strides = array<i32>} : memref<1x1xf32, #tpu.memory_space<vmem>>, vector<1x1xf32>,
    } else {
    }
    %c0_i32_20 = arith.constant 0 : i32
    %32 = arith.cmpi eq, %arg1, %c0_i32_20 : i32
    %33 = arith.extui %32 : i1 to i32
    %cst_21 = arith.constant 1.000000e+01 : f32
    %c0_i32_22 = arith.constant 0 : i32
    %34 = arith.cmpi ne, %33, %c0_i32_22 : i32
    scf.if %34 {
      %c0_27 = arith.constant 0 : index
      %c0_28 = arith.constant 0 : index
      %40 = vector.load %arg6[%c0_27, %c0_28] : memref<8x1xf32, #tpu.memory_space<vmem>>, vector<8x1xf32>
      %41 = math.log %40 : vector<8x1xf32>
      %42 = vector.broadcast %cst_21 : f32 to vector<8x1xf32>
      %43 = arith.addf %42, %41 : vector<8x1xf32>
      %c0_29 = arith.constant 0 : index
      %c0_30 = arith.constant 0 : index
      %44 = vector.load %arg8[%c0_29, %c0_30] : memref<1x1xf32, #tpu.memory_space<vmem>>, vector<1x1xf32>
      %45 = vector.shape_cast %43 : vector<8x1xf32> to vector<1x8x1xf32>
      %cst_31 = arith.constant dense<0.000000e+00> : vector<1xf32>
      %46 = vector.multi_reduction <add>, %45, %cst_31 [1, 2] : vector<1x8x1xf32> to vector<1xf32>
      %47 = vector.shape_cast %46 : vector<1xf32> to vector<1x1x1xf32>
      %48 = vector.extract %47[0, 0, 0] : f32 from vector<1x1x1xf32>
      %49 = vector.broadcast %48 : f32 to vector<1x1xf32>
      %50 = arith.addf %44, %49 : vector<1x1xf32>
      %c0_32 = arith.constant 0 : index
      %c0_33 = arith.constant 0 : index
      %51 = vector.load %arg8[%c0_32, %c0_33] : memref<1x1xf32, #tpu.memory_space<vmem>>, vector<1x1xf32>
      tpu.vector_store %arg8[%c0_32, %c0_33], %50 {strides = array<i32>} : memref<1x1xf32, #tpu.memory_space<vmem>>, vector<1x1xf32>,
    } else {
    }
    %c0_i32_23 = arith.constant 0 : i32
    %35 = arith.cmpi eq, %arg0, %c0_i32_23 : i32
    %c0_i32_24 = arith.constant 0 : i32
    %36 = arith.cmpi eq, %arg1, %c0_i32_24 : i32
    %37 = arith.andi %35, %36 : i1
    %38 = arith.extui %37 : i1 to i32
    %cst_25 = arith.constant 1.000000e+01 : f32
    %c0_i32_26 = arith.constant 0 : i32
    %39 = arith.cmpi ne, %38, %c0_i32_26 : i32
    scf.if %39 {
      %c0_27 = arith.constant 0 : index
      %c0_28 = arith.constant 0 : index
      %c0_29 = arith.constant 0 : index
      %40 = vector.load %arg7[%c0_27, %c0_28, %c0_29] : memref<1x1x8xf32, #tpu.memory_space<vmem>>, vector<1x1x8xf32>
      %cst_30 = arith.constant 1.000000e-30 : f32
      %41 = vector.broadcast %cst_30 : f32 to vector<1x1x8xf32>
      %42 = arith.maximumf %40, %41 : vector<1x1x8xf32>
      %43 = math.log %42 : vector<1x1x8xf32>
      %44 = vector.broadcast %cst_25 : f32 to vector<1x1x8xf32>
      %45 = arith.addf %44, %43 : vector<1x1x8xf32>
      %c0_31 = arith.constant 0 : index
      %c0_32 = arith.constant 0 : index
      %46 = vector.load %arg8[%c0_31, %c0_32] : memref<1x1xf32, #tpu.memory_space<vmem>>, vector<1x1xf32>
      %47 = vector.shape_cast %46 : vector<1x1xf32> to vector<1x1x1xf32>
      %cst_33 = arith.constant dense<0.000000e+00> : vector<1xf32>
      %48 = vector.multi_reduction <add>, %47, %cst_33 [1, 2] : vector<1x1x1xf32> to vector<1xf32>
      %49 = vector.shape_cast %48 : vector<1xf32> to vector<1x1x1xf32>
      %50 = vector.extract %49[0, 0, 0] : f32 from vector<1x1x1xf32>
      %51 = vector.shape_cast %45 : vector<1x1x8xf32> to vector<1x1x1x8xf32>
      %cst_34 = arith.constant dense<0.000000e+00> : vector<1xf32>
      %52 = vector.multi_reduction <add>, %51, %cst_34 [1, 2, 3] : vector<1x1x1x8xf32> to vector<1xf32>
      %53 = vector.shape_cast %52 : vector<1xf32> to vector<1x1x1x1xf32>
      %54 = vector.extract %53[0, 0, 0, 0] : f32 from vector<1x1x1x1xf32>
      %55 = arith.addf %50, %54 : f32
      %cst_35 = arith.constant 6.250000e-02 : f32
      %56 = arith.mulf %55, %cst_35 : f32
      %c0_36 = arith.constant 0 : index
      %c0_37 = arith.constant 0 : index
      %57 = memref.load %arg4[%c0_36, %c0_37] : memref<1x1xf32, #tpu.memory_space<smem>>
      memref.store %56, %arg4[%c0_36, %c0_37] : memref<1x1xf32, #tpu.memory_space<smem>>
    } else {
    }
    return
  }
  func.func @transform_0(%arg0: i32, %arg1: i32) -> (i32, i32) {
    %c0_i32 = arith.constant 0 : i32
    %c0_i32_0 = arith.constant 0 : i32
    return %arg0, %c0_i32 : i32, i32
  }
  func.func @transform_1(%arg0: i32, %arg1: i32) -> (i32, i32) {
    %c0_i32 = arith.constant 0 : i32
    %c0_i32_0 = arith.constant 0 : i32
    return %arg1, %c0_i32 : i32, i32
  }
  func.func @transform_2(%arg0: i32, %arg1: i32) -> (i32, i32) {
    %c0_i32 = arith.constant 0 : i32
    %c0_i32_0 = arith.constant 0 : i32
    %c0_i32_1 = arith.constant 0 : i32
    return %c0_i32, %c0_i32_0 : i32, i32
  }
}

</mosaic_0001>

<bundles_post_ra>
// kernel: tpu_custom_call.1
= control target key start
LH: loop header
LB: loop body
LE: loop exit
PB: predicated region body
PF: predicated region fallthrough
CT: control target
= control target key end

     0   :  { %7 = vsyncpa [#allocation7], 0  ;;  %s350_s0 = inlined_call_operand.hbm [shape: f32[8,32], index: 0, kind: input, shape index: {}]   ;;  %s351_s1 = inlined_call_operand.hbm [shape: bf16[8,32], index: 1, kind: input, shape index: {}]   ;;  %s352_s2 = inlined_call_operand.hbm [shape: f32[1,1], index: 2, kind: output, shape index: {}]  }
   0x1   :  { %8 = vsyncpa [#allocation10], 0 }
   0x2   :  { %9 = vsyncpa [#allocation8], 0  ;;  %s307_s9 = smov [#allocation6]   ;;  %s308_s11 = smov [#allocation9]  }
   0x3   :  { %s16_s10 = sshll.u32 %s307_s9, 4  ;;  %s26_s12 = sshll.u32 %s308_s11, 4  ;;  %s17_s10 = int_to_ptr.vmem [resolvable:$true] %s16_s10  ;;  %s27_s12 = int_to_ptr.vmem [resolvable:$true] %s26_s12 }
   0x4   :  { %s261_s13 = scalar_lea.vmem %s17_s10, 128  ;;  %p266_p1 = scmp.lt.s32.totalorder %s17_s10, %s17_s10 }
   0x5   :  { %p262_p0 = scmp.ne.s32.totalorder %s17_s10, %s261_s13  ;;  %p267_p2 = scmp.lt.s32.totalorder %s261_s13, %s261_s13 }
   0x7   :  { %p268_p3 = por %p267_p2, %p266_p1 }
   0x9   :  { %p269_p4 = pnand %p268_p3, %p262_p0 }
   0xb   :  { %272 = shalt.err (!%p269_p4)
}
   0xc   :  { %19 = dma.hbm_to_vmem [thread:$0]  %s350_s0, 128, %s17_s10, [#allocation7]  }
   0xd   :  { %s281_s16 = scalar_lea.vmem %s27_s12, 64  ;;  %p286_p6 = scmp.lt.s32.totalorder %s27_s12, %s27_s12 }
   0xe   :  { %p282_p5 = scmp.ne.s32.totalorder %s27_s12, %s281_s16  ;;  %p287_p7 = scmp.lt.s32.totalorder %s281_s16, %s281_s16 }
  0x10   :  { %p288_p8 = por %p287_p7, %p286_p6 }
  0x12   :  { %p289_p9 = pnand %p288_p8, %p282_p5 }
  0x14   :  { %292 = shalt.err (!%p289_p9)
}
  0x15   :  { %29 = dma.hbm_to_vmem [thread:$0]  %s351_s1, 64, %s27_s12, [#allocation10]  }
  0x16   :  { %301 = dma.done.wait [#allocation7], 128  }
  0x17   :  { %302 = vsyncadd [#allocation7], 4294967168 }
  0x18   :  { %303 = dma.done.wait [#allocation10], 64  }
  0x19   :  { %304 = vsyncadd [#allocation10], 4294967232  ;;  %v50_v0 = vld [vmem:[#allocation6] sm:$0xff]  ;;  %vm52_vm0 = vcmask 261120   ;;  %v66_v3 = vld [vmem:[#allocation9] sm:$0xf] }
  0x1a   :  { %v51_v1 = vmul.f32 %v50_v0, %v50_v0  ;;  %vm45_vm1 = vcmask 0   ;;  %v309_v4 = vmov 0.0   ;;  %v72_v5 = vsel %vm52_vm0, %v66_v3, 0  ;;  %s311_s23 = smov [#allocation11]  }
  0x1b   :  { %226 = vmatprep.subr.bf16.mxu0 %v309_v4  ;;  %46 = vst.msk [vmem:[#allocation5] sm:$0x1] %vm45_vm1, %v309_v4  ;;  %vm310_vm2 = vmmov 0   ;;  %vm61_vm3 = vcmask 257024   ;;  %v140_v12 = vunpack.c.l.bf16 %v66_v3  ;;  %vm63_vm4 = vcmask 7168  }
  0x1c   :  { %v53_v2 = vsel %vm52_vm0, %v51_v1, 0.0  ;;  %227 = vmatpush3.bf16.xpose.msra.mxu0 %v72_v5  ;;  %228 = vmatprep.mubr.msk.bf16.mxu0 %vm310_vm2, %v309_v4  ;;  %64 = vst.msk [vmem:[#allocation3] sm:$0xff] %vm63_vm4, %v309_v4  ;;  %vm43_vm5 = vcmask 57344   ;;  %vm118_vm6 = vcmask 64512  }
  0x1d   :  { %54 = vadd.xlane.f32.xlu0 %v53_v2  ;;  %44 = vst.msk [vmem:[#allocation4] sm:$0x1] %vm43_vm5, %v309_v4 }
  0x22   :  { %v145_v48 = vld [vmem:[#allocation5] sm:$0x1] }
  0x23   :  { %v117_v52 = vld [vmem:[#allocation3] sm:$0xff] }
  0x24   :  { %v125_v32 = vld [vmem:[#allocation4] sm:$0x1] }
  0xa6   :  { %v55_v6 = vpop.xlane.xlu0 %54 }
  0xa7   :  { %v56_v7 = vmax.f32 %v55_v6, 1e-24 }
  0xa9   :  { %245 = vrsqrt.f32 %v56_v7 }
  0xb6   :  { %v246_v8 = vpop.eup %245 }
  0xb7   :  { %v58_v9 = vmul.f32 10.0, %v246_v8 }
  0xb9   :  { %v59_v10 = vmul.f32 %v58_v9, %v50_v0 }
  0xbb   :  { %v60_v11 = vpack.c.bf16 %v59_v10, %v59_v10 }
  0xbd   :  { %62 = vst.msk [vmem:[#allocation2] sm:$0xf] %vm61_vm3, %v60_v11 }
  0xc4   :  { %v65_v13 = vld [vmem:[#allocation2] sm:$0xf] }
  0xc5   :  { %229 = vmatmul.mubr.msk.bf16.vlgmr.msra.gmra.mxu0 %vm52_vm0, %v65_v13  ;;  %v139_v14 = vunpack.c.l.bf16 %v65_v13 }
  0xc7   :  { %v141_v15 = vmul.f32 %v140_v12, %v139_v14 }
  0xc9   :  { %v142_v16 = vsel %vm52_vm0, %v141_v15, 0.0 }
  0xca   :  { %143 = vadd.xlane.f32.xlu1 %v142_v16 }
 0x153   :  { %v144_v17 = vpop.xlane.xlu1 %143 }
 0x154   :  { %v146_v18 = vsel %vm63_vm4, %v144_v17, 0.0 }
 0x155   :  { %147 = vadd.xlane.f32.xlu1 %v146_v18 }
 0x185   :  { %v108_v19 = vpop.f32.mrf.mxu0 }
 0x186   :  { %v223_v20 = vadd.f32 -10.0, %v108_v19 }
 0x187   :  { %v230_v21 = vpop.f32.mrf.mxu0 }
 0x188   :  { %v115_v22 = vmul.f32 1.442695, %v223_v20 }
 0x189   :  { %v111_v23 = vpop.f32.mrf.mxu0 }
 0x18a   :  { %247 = vpow2.f32 %v115_v22 }
 0x18b   :  { %v231_v24 = vpop.f32.mrf.mxu0 }
 0x197   :  { %v248_v25 = vpop.eup %247 }
 0x198   :  { %v119_v26 = vsel %vm118_vm6, %v248_v25, 0.0 }
 0x199   :  { %120 = vadd.xlane.f32.xlu0 %v119_v26  ;;  %v126_v27 = vrot.slane %v119_v26, 4 }
 0x19b   :  { %v127_v28 = vadd.f32 %v126_v27, %v119_v26 }
 0x19d   :  { %v128_v29 = vrot.slane %v127_v28, 2 }
 0x19f   :  { %v129_v30 = vadd.f32 %v128_v29, %v127_v28 }
 0x1a1   :  { %v130_v31 = vrot.slane %v129_v30, 1 }
 0x1a3   :  { %v131_v33 = vadd.f32 %v130_v31, %v129_v30 }
 0x1a5   :  { %v132_v34 = vadd.f32 %v131_v33, %v125_v32 }
 0x1a7   :  { %134 = vst.msk [vmem:[#allocation4] sm:$0x1] %vm43_vm5, %v132_v34 }
 0x1ae   :  { %v185_v35 = vld [vmem:[#allocation4] sm:$0x1] }
 0x1af   :  { %v186_v36 = vmax.f32 %v185_v35, 1e-30 }
 0x1b1   :  { %249 = vlog2.f32 %v186_v36 }
 0x1be   :  { %v250_v37 = vpop.eup %249 }
 0x1bf   :  { %v188_v38 = vmul.f32 0.6931472, %v250_v37 }
 0x1c1   :  { %v189_v39 = vadd.f32 10.0, %v188_v38 }
 0x1c3   :  { %v193_v40 = vsel %vm43_vm5, %v189_v39, 0.0 }
 0x1c4   :  { %194 = vadd.xlane.f32.xlu1 %v193_v40 }
 0x1de   :  { %v148_v41 = vpop.xlane.xlu1 %147 }
 0x1df   :  { %v149_v42 = vrot.slane %v148_v41, 4 }
 0x1e1   :  { %v150_v43 = vadd.f32 %v149_v42, %v148_v41 }
 0x1e3   :  { %v151_v44 = vrot.slane %v150_v43, 2 }
 0x1e5   :  { %v152_v45 = vadd.f32 %v151_v44, %v150_v43 }
 0x1e7   :  { %v153_v46 = vrot.slane %v152_v45, 1 }
 0x1e9   :  { %v154_v47 = vadd.f32 %v153_v46, %v152_v45 }
 0x1eb   :  { %232 = vpush %v154_v47 }
 0x21c   :  { %s233_s0 = spop %232 }
 0x21d   :  { %v156_v49 = vstv %s233_s0 }
 0x21e   :  { %v157_v50 = vmul.f32 -2.0, %v156_v49 }
 0x220   :  { %v158_v51 = vadd.f32 %v157_v50, %v145_v48 }
 0x222   :  { %160 = vst.msk [vmem:[#allocation5] sm:$0x1] %vm45_vm1, %v158_v51  ;;  %v121_v53 = vpop.xlane.xlu0 %120 }
 0x223   :  { %v122_v54 = vadd.f32 %v121_v53, %v117_v52 }
 0x225   :  { %124 = vst.msk [vmem:[#allocation3] sm:$0xff] %vm63_vm4, %v122_v54 }
 0x229   :  { %v168_v7 = vld [vmem:[#allocation5] sm:$0x1] }
 0x22c   :  { %v164_v55 = vld [vmem:[#allocation3] sm:$0xff] }
 0x22d   :  { %251 = vlog2.f32 %v164_v55 }
 0x23a   :  { %v252_v56 = vpop.eup %251 }
 0x23b   :  { %v166_v57 = vmul.f32 0.6931472, %v252_v56 }
 0x23d   :  { %v167_v58 = vadd.f32 10.0, %v166_v57 }
 0x23f   :  { %v169_v59 = vsel %vm63_vm4, %v167_v58, 0.0 }
 0x240   :  { %170 = vadd.xlane.f32.xlu0 %v169_v59 }
 0x24d   :  { %v195_v3 = vpop.xlane.xlu1 %194 }
 0x24e   :  { %v196_v4 = vrot.slane %v195_v3, 4 }
 0x250   :  { %v197_v5 = vadd.f32 %v196_v4, %v195_v3 }
 0x252   :  { %v198_v6 = vrot.slane %v197_v5, 2 }
 0x254   :  { %v199_v10 = vadd.f32 %v198_v6, %v197_v5 }
 0x256   :  { %v200_v11 = vrot.slane %v199_v10, 1 }
 0x258   :  { %v201_v13 = vadd.f32 %v200_v11, %v199_v10 }
 0x2c9   :  { %v171_v60 = vpop.xlane.xlu0 %170 }
 0x2ca   :  { %v172_v61 = vrot.slane %v171_v60, 4 }
 0x2cc   :  { %v173_v62 = vadd.f32 %v172_v61, %v171_v60 }
 0x2ce   :  { %v174_v63 = vrot.slane %v173_v62, 2 }
 0x2d0   :  { %v175_v0 = vadd.f32 %v174_v63, %v173_v62 }
 0x2d2   :  { %v176_v1 = vrot.slane %v175_v0, 1 }
 0x2d4   :  { %v177_v2 = vadd.f32 %v176_v1, %v175_v0 }
 0x2d6   :  { %234 = vpush %v177_v2 }
 0x307   :  { %s235_s1 = spop %234 }
 0x308   :  { %v179_v8 = vstv %s235_s1 }
 0x309   :  { %v180_v9 = vadd.f32 %v179_v8, %v168_v7 }
 0x30b   :  { %182 = vst.msk [vmem:[#allocation5] sm:$0x1] %vm45_vm1, %v180_v9 }
 0x312   :  { %v190_v12 = vld [vmem:[#allocation5] sm:$0x1] }
 0x313   :  { %236 = vpush %v190_v12 }
 0x314   :  { %238 = vpush %v201_v13 }
 0x344   :  { %s237_s19 = spop %236 }
 0x345   :  { %s239_s20 = spop %238 }
 0x346   :  { %s203_s21 = sadd.f32 %s239_s20, %s237_s19 }
 0x348   :  { %s204_s22 = smul.f32 0.0625, %s203_s21 }
 0x34a   :  { %206 = sst [smem:[#allocation11]] %s204_s22 }
 0x34b   :  { %214 = dma.smem_to_hbm %s311_s23, 16, %s352_s2, [#allocation8]  }
 0x34c   :  { %305 = dma.done.wait [#allocation8], 16  }
 0x34d   :  { %306 = vsyncadd [#allocation8], 4294967280 }
 0x34e   :  { %218 = sfence }
 0x34f   :  { %219 = vsyncpa [#allocation7], 1 }
 0x350   :  { %220 = vsyncpa [#allocation10], 1 }
 0x351   :  { %221 = vsyncpa [#allocation8], 1 }

</bundles_post_ra>
